<compile_context>
chip_gen: v5e
topology: v5e:2x2
jax: 0.10.0
libtpu: 0.0.40
codegen_flags: <defaults>
</compile_context>

<pallas_src>
import functools

import jax
import jax.numpy as jnp
from jax import lax
from jax.experimental import pallas as pl
from jax.experimental.pallas import tpu as pltpu


def _round_up(a, b):
    return ((a + b - 1) // b) * b


def _linear_kernel(x_ref, w_ref, b_ref, o_ref, *, mxu_dtype=None):
    """One (block_mq, Kp) x (Kp, Np) MXU matmul tile + f32 bias-add epilogue."""
    x = x_ref[...]
    if mxu_dtype is not None:
        # In-kernel cast of the streaming operand: VPU work hidden under the DMA slack.
        x = x.astype(mxu_dtype)
    acc = jnp.dot(x, w_ref[...], preferred_element_type=jnp.float32)
    o_ref[...] = (acc + b_ref[...]).astype(o_ref.dtype)
    # TODO(synk): fold any downstream elementwise consumer (activation / norm / dropout)
    # into this epilogue instead of a separate pallas_call / XLA op.


def _choose_pack(M, N, max_pack=8):
    """Smallest p with (p*N) % 128 == 0 that also divides M (so the pack/unpack
    reshapes are free row-major bitcasts).  Stops at the first hit: further doubling
    (e.g. p=4 to also make p*K lane-dense) only inflates the block-diagonal MXU flops
    and resident weight with zero HBM-bandwidth benefit (perf review)."""
    for p in range(1, max_pack + 1):
        if (p * N) % 128 == 0 and M % p == 0:
            return p
    return 1


@functools.partial(
    jax.jit,
    static_argnames=("target_block_rows", "min_rows_for_pallas", "mxu_dtype", "out_dtype"),
)
def feature_embedding(
    x,
    weight_t,
    bias,
    *,
    target_block_rows=8192,
    min_rows_for_pallas=1024,
    mxu_dtype=None,
    out_dtype=None,
):
    """y = x @ weight_t + bias  (== FeatureEmbedding.forward == nn.Linear forward)

    x:        (..., K)  features
    weight_t: (K, N)    linear weight, transposed from PyTorch's (N, K)
    bias:     (N,)
    returns:  (..., N)
    """
    *lead, K = x.shape
    Kw, N = weight_t.shape
    assert K == Kw
    out_dtype = x.dtype if out_dtype is None else out_dtype

    M = 1
    for d in lead:
        M *= d
    x2d = x.reshape(M, K)

    # Tiny problems: pallas_call launch / DMA latency would dominate; let XLA fuse it.
    # HIGHEST == exact multi-pass f32 matmul, matching the kernel's f32 MXU path.
    if M == 0 or M < min_rows_for_pallas:
        y = jnp.dot(x2d, weight_t, precision=lax.Precision.HIGHEST) + bias
        return y.astype(out_dtype).reshape(*lead, N)

    if mxu_dtype is not None:
        weight_t = weight_t.astype(mxu_dtype)  # tiny; x is cast inside the kernel

    # ---- Lane packing: fold p consecutive rows so the *output* last dim is a
    # 128-multiple (unmasked vst).  p must divide M so both reshapes are free
    # row-major bitcasts (no wrapper pad/slice -> no extra HBM passes).  If no such p
    # exists (e.g. odd M with N=64) we run p=1: still correct, just lane-masked stores.
    p = _choose_pack(M, N)
    Kp, Np = p * K, p * N
    Mq = M // p
    x_p = x2d.reshape(Mq, Kp)

    if p == 1:
        w_p = weight_t
        b_p = bias.reshape(1, N).astype(jnp.float32)
    else:
        # p-way block-diagonal weight; the off-diagonal entries are exact zeros,
        # so the packed matmul is bit-exact w.r.t. the unpacked one.
        w_p = jnp.kron(jnp.eye(p, dtype=weight_t.dtype), weight_t)
        b_p = jnp.tile(bias, p).reshape(1, Np).astype(jnp.float32)

    # ---- Row tiling: big tiles (~3 MB/step) to amortise the ~0.35 us per-step cost,
    # sublane aligned, and split so grid_m >= 2 whenever M allows (v7x megacore).
    sub = 16  # sublane multiple (also covers bf16 operand packing)
    block_mq = max(sub, (target_block_rows // p // sub) * sub)
    if Mq <= block_mq:
        if Mq >= 2 * sub:
            block_mq = _round_up(pl.cdiv(Mq, 2), sub)  # exactly 2 grid steps
        else:
            block_mq = Mq                              # single full-extent block
    grid_m = pl.cdiv(Mq, block_mq)  # ragged tail block handled by Pallas masking

    # Explicit VMEM budget.  32 MiB cap is safe on every generation (v7x default scoped
    # limit); our ~3 MB/step tiles use well under half of it even double-buffered.
    x_bytes = jnp.dtype(x_p.dtype).itemsize
    o_bytes = jnp.dtype(out_dtype).itemsize
    w_bytes = jnp.dtype(w_p.dtype).itemsize
    vmem_needed = (
        2 * block_mq * Kp * x_bytes      # double-buffered x tiles
        + 2 * block_mq * Np * o_bytes    # double-buffered y tiles
        + 2 * Kp * Np * w_bytes          # weight (constant index_map: fetched once)
        + 2 * Np * 4                     # bias
    )
    vmem_limit = int(min(max(2 * vmem_needed, 8 * 1024 * 1024), 32 * 1024 * 1024))
    # TODO(synk): if feature_dim * embed_dim ever grows to MiB scale, add a K grid axis
    # with an f32 VMEM accumulator instead of a fully-resident (Kp, Np) weight.

    out_p = pl.pallas_call(
        functools.partial(_linear_kernel, mxu_dtype=mxu_dtype),
        out_shape=jax.ShapeDtypeStruct((Mq, Np), out_dtype),
        grid_spec=pltpu.PrefetchScalarGridSpec(
            num_scalar_prefetch=0,
            grid=(grid_m,),
            in_specs=[
                pl.BlockSpec((block_mq, Kp), lambda i: (i, 0)),
                # Constant index_map -> the pipeline does not re-DMA these per step;
                # the second buffer only costs ~64 KiB, so explicit single-buffering
                # (pl.Buffered(1)) is not worth the extra lowering surface here.
                pl.BlockSpec((Kp, Np), lambda i: (0, 0)),
                pl.BlockSpec((1, Np), lambda i: (0, 0)),
            ],
            out_specs=pl.BlockSpec((block_mq, Np), lambda i: (i, 0)),
        ),
        compiler_params=pltpu.CompilerParams(
            dimension_semantics=("parallel",),
            vmem_limit_bytes=vmem_limit,
        ),
    )(x_p, w_p, b_p)

    # Free row-major un-pack: (Mq, p*N) -> (..., N).  No slicing, no extra HBM pass.
    return out_p.reshape(*lead, N)


if __name__ == "__main__":
    key = jax.random.PRNGKey(0)
    kx, kw, kb, kx2, kx3 = jax.random.split(key, 5)

    batch, seq = 2, 8
    feature_dim = 32          # args.feature_dim
    encoder_embed_dim = 64    # args.encoder_embed_dim

    # nn.Linear default init: U(-1/sqrt(in), 1/sqrt(in)); weight stored transposed.
    bound = 1.0 / (feature_dim ** 0.5)
    weight_t = jax.random.uniform(
        kw, (feature_dim, encoder_embed_dim), jnp.float32, -bound, bound
    )
    bias = jax.random.uniform(kb, (encoder_embed_dim,), jnp.float32, -bound, bound)

    def ref(xx):
        return (
            jnp.einsum("...k,kn->...n", xx, weight_t, precision=lax.Precision.HIGHEST)
            + bias
        )

    # 1) Small demo shape, forced through the Pallas path (single block, p=2 packing).
    x = jax.random.normal(kx, (batch, seq, feature_dim), dtype=jnp.float32)
    y = jax.block_until_ready(feature_embedding(x, weight_t, bias, min_rows_for_pallas=0))
    assert y.shape == (batch, seq, encoder_embed_dim)
    assert jnp.allclose(y, ref(x), atol=1e-5, rtol=1e-5)

    # 2) Larger ragged shape: 2-step grid, Pallas-masked tail block, no wrapper pad/slice.
    x_big = jax.random.normal(kx2, (4, 515, feature_dim), dtype=jnp.float32)
    y_big = jax.block_until_ready(feature_embedding(x_big, weight_t, bias))
    assert y_big.shape == (4, 515, encoder_embed_dim)
    assert jnp.allclose(y_big, ref(x_big), atol=1e-5, rtol=1e-5)

    # 3) Odd row count exercises the p=1 (no lane packing) path.
    x_odd = jax.random.normal(kx3, (3, 7, feature_dim), dtype=jnp.float32)
    y_odd = jax.block_until_ready(
        feature_embedding(x_odd, weight_t, bias, min_rows_for_pallas=0)
    )
    assert y_odd.shape == (3, 7, encoder_embed_dim)
    assert jnp.allclose(y_odd, ref(x_odd), atol=1e-5, rtol=1e-5)

    print("KERNEL_OK")
</pallas_src>

<mosaic_0001>
module attributes {stable_mosaic.version = 11 : i64} {
  func.func @_linear_kernel(%arg0: i32, %arg1: memref<8x64xf32, #tpu.memory_space<vmem>>, %arg2: memref<64x128xf32, #tpu.memory_space<vmem>>, %arg3: memref<1x128xf32, #tpu.memory_space<vmem>>, %arg4: memref<8x128xf32, #tpu.memory_space<vmem>>) attributes {dimension_semantics = [#tpu.dimension_semantics<parallel>], iteration_bounds = array<i64: 1>, scalar_prefetch = 0 : i64, scratch_operands = 0 : i64, tpu.core_type = #tpu.core_type<tc>, window_params = [{transform_indices = @transform_0, window_bounds = array<i64: 8, 64>}, {pipeline_mode = #tpu.pipeline_mode<synchronous>, transform_indices = @transform_1, window_bounds = array<i64: 64, 128>}, {pipeline_mode = #tpu.pipeline_mode<synchronous>, transform_indices = @transform_2, window_bounds = array<i64: 1, 128>}, {transform_indices = @transform_3, window_bounds = array<i64: 8, 128>}]} {
    %c0 = arith.constant 0 : index
    %c0_0 = arith.constant 0 : index
    %0 = vector.load %arg1[%c0, %c0_0] : memref<8x64xf32, #tpu.memory_space<vmem>>, vector<8x64xf32>
    %c0_1 = arith.constant 0 : index
    %c0_2 = arith.constant 0 : index
    %1 = vector.load %arg2[%c0_1, %c0_2] : memref<64x128xf32, #tpu.memory_space<vmem>>, vector<64x128xf32>
    %cst = arith.constant dense<0.000000e+00> : vector<8x128xf32>
    %2 = tpu.matmul %0, %1, %cst {dimension_numbers = #tpu.dot_dimension_numbers<[1], [0], [0], [1], [0, 0, 1, 1], [], []>} : vector<8x64xf32>, vector<64x128xf32>, vector<8x128xf32> -> vector<8x128xf32>
    %c0_3 = arith.constant 0 : index
    %c0_4 = arith.constant 0 : index
    %3 = vector.load %arg3[%c0_3, %c0_4] : memref<1x128xf32, #tpu.memory_space<vmem>>, vector<1x128xf32>
    %4 = vector.broadcast %3 : vector<1x128xf32> to vector<8x128xf32>
    %5 = arith.addf %2, %4 : vector<8x128xf32>
    %c0_5 = arith.constant 0 : index
    %c0_6 = arith.constant 0 : index
    %6 = vector.load %arg4[%c0_5, %c0_6] : memref<8x128xf32, #tpu.memory_space<vmem>>, vector<8x128xf32>
    tpu.vector_store %arg4[%c0_5, %c0_6], %5 {strides = array<i32>} : memref<8x128xf32, #tpu.memory_space<vmem>>, vector<8x128xf32>,
    return
  }
  func.func @transform_0(%arg0: i32) -> (i32, i32) {
    %c0_i32 = arith.constant 0 : i32
    %c0_i32_0 = arith.constant 0 : i32
    return %arg0, %c0_i32 : i32, i32
  }
  func.func @transform_1(%arg0: i32) -> (i32, i32) {
    %c0_i32 = arith.constant 0 : i32
    %c0_i32_0 = arith.constant 0 : i32
    %c0_i32_1 = arith.constant 0 : i32
    return %c0_i32, %c0_i32_0 : i32, i32
  }
  func.func @transform_2(%arg0: i32) -> (i32, i32) {
    %c0_i32 = arith.constant 0 : i32
    %c0_i32_0 = arith.constant 0 : i32
    %c0_i32_1 = arith.constant 0 : i32
    return %c0_i32, %c0_i32_0 : i32, i32
  }
  func.func @transform_3(%arg0: i32) -> (i32, i32) {
    %c0_i32 = arith.constant 0 : i32
    %c0_i32_0 = arith.constant 0 : i32
    return %arg0, %c0_i32 : i32, i32
  }
}

</mosaic_0001>

<bundles_post_ra>
// kernel: tile.8
= control target key start
LH: loop header
LB: loop body
LE: loop exit
PB: predicated region body
PF: predicated region fallthrough
CT: control target
= control target key end

     0   :  { %s22_s0 = inlined_call_operand.vmem [shape: f32[64], index: 0, kind: input, shape index: {}]   ;;  %s23_s1 = inlined_call_operand.vmem [shape: f32[2,64], index: 1, kind: output, shape index: {}]  }
   0x1   :  { %v4_v0 = vld [vmem:[%s22_s0] ss:$0 sm:$0xff] }
   0x2   :  { %5 = vst [vmem:[%s23_s1] sm:$0x3] %v4_v0 }

// kernel: tile.9
= control target key start
LH: loop header
LB: loop body
LE: loop exit
PB: predicated region body
PF: predicated region fallthrough
CT: control target
= control target key end

     0   :  { %vm7_vm0 = vcmask 523264   ;;  %vm13_vm1 = vcmask 1048064   ;;  %s39_s0 = inlined_call_operand.vmem [shape: f32[2,64], index: 0, kind: input, shape index: {}]   ;;  %s40_s1 = inlined_call_operand.vmem [shape: f32[1,128], index: 1, kind: output, shape index: {}]  }
   0x1   :  { %v4_v0 = vld [vmem:[%s39_s0] sm:$0x3]  ;;  %s22_s0 = smov 64  }
   0x2   :  { %5 = vst [vmem:[#allocation1] sm:$0x3] %v4_v0 }
   0x9   :  { %v10_v1 = vld [vmem:[#allocation1 + $0x1] sm:$0x1]   ;;  %v6_v2 = vld [vmem:[#allocation1] sm:$0x1]  }
   0xa   :  { %11 = vrot.lane.b32.xlu0 %v10_v1, %s22_s0  ;;  %8 = vst.msk [vmem:[#allocation0] sm:$0x1] %vm7_vm0, %v6_v2  }
  0x7c   :  { %v12_v3 = vpop.permute.xlu0 %11  }
  0x7d   :  { %14 = vst.msk [vmem:[#allocation0] sm:$0x1] %vm13_vm1, %v12_v3  }
  0x84   :  { %v17_v4 = vld [vmem:[#allocation0] sm:$0x1] }
  0x85   :  { %20 = vst [vmem:[%s40_s1] sm:$0x1] %v17_v4 }

// kernel: feature_embedding.1
= control target key start
LH: loop header
LB: loop body
LE: loop exit
PB: predicated region body
PF: predicated region fallthrough
CT: control target
= control target key end

     0   :  { %vm27_vm0 = vcmask 523264   ;;  %s111_s1 = inlined_call_operand.vmem [shape: f32[64,128], index: 1, kind: input, shape index: {}]   ;;  %s112_s2 = inlined_call_operand.vmem [shape: f32[1,128], index: 2, kind: input, shape index: {}]   ;;  %s113_s0 = inlined_call_operand.vmem [shape: f32[8,64], index: 0, kind: input, shape index: {}]   ;;  %s114_s3 = inlined_call_operand.vmem [shape: f32[8,128], index: 3, kind: output, shape index: {}]  }
   0x1   :  { %v22_v0 = vld [vmem:[%s111_s1 + $0x38] sm:$0xff]  ;;  %v21_v1 = vld [vmem:[%s111_s1 + $0x30] sm:$0xff]  ;;  %v20_v2 = vld [vmem:[%s111_s1 + $0x28] sm:$0xff] }
   0x2   :  { %39 = vmatpush.msra.mxu0 %v22_v0  ;;  %v19_v3 = vld [vmem:[%s111_s1 + $0x20] sm:$0xff]  ;;  %v18_v4 = vld [vmem:[%s111_s1 + $0x18] sm:$0xff]  ;;  %v17_v5 = vld [vmem:[%s111_s1 + $0x10] sm:$0xff] }
   0x3   :  { %v16_v6 = vld [vmem:[%s111_s1 + $0x8] sm:$0xff]  ;;  %v15_v7 = vld [vmem:[%s111_s1] sm:$0xff] }
   0x4   :  { %40 = vmatpush.msra.mxu0 %v21_v1  ;;  %v14_v8 = vld [vmem:[%s113_s0] sm:$0xff] }
   0x5   :  { %v57_v9 = vld [vmem:[%s112_s2] ss:$0 sm:$0xff] }
   0x6   :  { %41 = vmatpush.msra.mxu0 %v20_v2 }
   0x8   :  { %42 = vmatpush.msra.mxu0 %v19_v3 }
   0xa   :  { %43 = vmatpush.msra.mxu0 %v18_v4 }
   0xc   :  { %44 = vmatpush.msra.mxu0 %v17_v5 }
   0xe   :  { %45 = vmatpush.msra.mxu0 %v16_v6 }
  0x10   :  { %46 = vmatpush.msra.mxu0 %v15_v7 }
  0x11   :  { %56 = vmatmul.msk.f32.vlgmr.msra.gmra.mxu0 %vm27_vm0, %v14_v8 }
  0x8e   :  { %v48_v10 = vpop.f32.mrf.mxu0 }
  0x8f   :  { %v49_v11 = vadd.f32 %v57_v9, %v48_v10 }
  0x91   :  { %51 = vst [vmem:[%s114_s3] sm:$0xff] %v49_v11 }

</bundles_post_ra>
